<compile_context>
chip_gen: v7x
topology: tpu7x:2x2x1
jax: 0.10.0
libtpu: 0.0.40
codegen_flags: <defaults>
</compile_context>

<pallas_src>
import functools

import jax
import jax.numpy as jnp
from jax.experimental import pallas as pl
from jax.experimental.pallas import tpu as pltpu


def _round_up(x, m):
    return ((x + m - 1) // m) * m


def _cast(v, dt):
    return v if v.dtype == dt else v.astype(dt)


# -----------------------------------------------------------------------------
# Kernel: fused (mu + value) MLP, one lane-dense output slab per row tile.
# -----------------------------------------------------------------------------
def _mujoco_ff_fused_kernel(x_ref, w1_ref, b1_ref, w2_ref, b2_ref,
                            wo_ref, bo_ref, out_ref, *, action_size):
    mm_dtype = w1_ref.dtype
    x = _cast(x_ref[...], mm_dtype)

    h = jnp.tanh(
        jnp.dot(x, w1_ref[...], preferred_element_type=jnp.float32)
        + b1_ref[...])
    h = jnp.tanh(
        jnp.dot(_cast(h, mm_dtype), w2_ref[...],
                preferred_element_type=jnp.float32)
        + b2_ref[...])
    out = (jnp.dot(_cast(h, mm_dtype), wo_ref[...],
                   preferred_element_type=jnp.float32)
           + bo_ref[...])

    # mu_nonlinearity = Tanh applies only to the action columns; the value
    # column (index action_size) and the zero-padding lanes stay linear.
    col = jax.lax.broadcasted_iota(jnp.int32, out.shape, dimension=1)
    out_ref[...] = jnp.where(col < action_size, jnp.tanh(out), out)


# -----------------------------------------------------------------------------
# Parameter fusion (done once, outside the kernel).
# -----------------------------------------------------------------------------
def fuse_params(params, matmul_dtype=jnp.float32):
    """Fuse mu/value MLP weights into one 128-wide matmul chain.

    Weights are stored [in, out].  Layer 1 is concatenated along the output
    axis, layer 2 is block-diagonal, and the output layer packs
    [mu (A cols) | v (1 col) | zero pad] into a lane-dense [H2, 128] matrix.
    """
    mu_w1, mu_b1 = params["mu_w1"], params["mu_b1"]
    mu_w2, mu_b2 = params["mu_w2"], params["mu_b2"]
    mu_wo, mu_bo = params["mu_wo"], params["mu_bo"]
    v_w1, v_b1 = params["v_w1"], params["v_b1"]
    v_w2, v_b2 = params["v_w2"], params["v_b2"]
    v_wo, v_bo = params["v_wo"], params["v_bo"]

    A = mu_wo.shape[1]
    h1m, h2m = mu_w2.shape
    h1v, h2v = v_w2.shape
    out_pad = _round_up(A + 1, 128)

    w1 = jnp.concatenate([mu_w1, v_w1], axis=1)                    # [D, H1]
    b1 = jnp.concatenate([mu_b1, v_b1], axis=1)                    # [1, H1]

    w2 = jnp.zeros((h1m + h1v, h2m + h2v), jnp.float32)            # [H1, H2]
    w2 = w2.at[:h1m, :h2m].set(mu_w2)
    w2 = w2.at[h1m:, h2m:].set(v_w2)
    b2 = jnp.concatenate([mu_b2, v_b2], axis=1)                    # [1, H2]

    wo = jnp.zeros((h2m + h2v, out_pad), jnp.float32)              # [H2, 128]
    wo = wo.at[:h2m, :A].set(mu_wo)
    wo = wo.at[h2m:, A:A + 1].set(v_wo)
    bo = jnp.zeros((1, out_pad), jnp.float32)
    bo = bo.at[:, :A].set(mu_bo)
    bo = bo.at[:, A:A + 1].set(v_bo)

    return dict(
        W1=w1.astype(matmul_dtype), b1=b1.astype(jnp.float32),
        W2=w2.astype(matmul_dtype), b2=b2.astype(jnp.float32),
        Wo=wo.astype(matmul_dtype), bo=bo.astype(jnp.float32),
        log_std=params["log_std"].reshape(-1).astype(jnp.float32),
        action_size=int(A),
    )


# -----------------------------------------------------------------------------
# Forward wrapper.
# -----------------------------------------------------------------------------
def mujoco_ff_forward(observation, fused, obs_ndim, *,
                      tile_rows=256, min_rows_for_kernel=1024):
    """observation: leading dims [T,B], [B] or [] plus obs dims (f32)."""
    A = fused["action_size"]
    lead_ndim = observation.ndim - obs_ndim
    lead_shape = observation.shape[:lead_ndim]
    if lead_ndim == 0:
        T, B = 1, 1
    elif lead_ndim == 1:
        T, B = 1, observation.shape[0]
    elif lead_ndim == 2:
        T, B = observation.shape[0], observation.shape[1]
    else:
        raise ValueError("leading dims must be [], [B], or [T,B]")
    N = T * B

    compute_dtype = fused["W1"].dtype
    x = _cast(observation.reshape(N, -1), compute_dtype)
    D = x.shape[1]
    H1 = fused["W1"].shape[1]
    H2 = fused["W2"].shape[1]
    OUT = fused["Wo"].shape[1]

    if N < min_rows_for_kernel:
        # Tiny batch: plain XLA is faster than any Pallas launch.
        h = jnp.tanh(jnp.dot(x, fused["W1"],
                             preferred_element_type=jnp.float32) + fused["b1"])
        h = jnp.tanh(jnp.dot(h, fused["W2"],
                             preferred_element_type=jnp.float32) + fused["b2"])
        slab = jnp.dot(h, fused["Wo"],
                       preferred_element_type=jnp.float32) + fused["bo"]
        mu = jnp.tanh(slab[:, :A])
        v = slab[:, A]
    else:
        tile = _round_up(min(tile_rows, _round_up(N, 8)), 8)
        n_pad = _round_up(N, tile)
        x_in = x if n_pad == N else jnp.pad(x, ((0, n_pad - N), (0, 0)))

        kernel = functools.partial(_mujoco_ff_fused_kernel, action_size=A)
        slab = pl.pallas_call(
            kernel,
            grid=(n_pad // tile,),
            in_specs=[
                pl.BlockSpec((tile, D), lambda i: (i, 0)),   # x: row-tiled
                pl.BlockSpec((D, H1), lambda i: (0, 0)),     # weights stay put
                pl.BlockSpec((1, H1), lambda i: (0, 0)),
                pl.BlockSpec((H1, H2), lambda i: (0, 0)),
                pl.BlockSpec((1, H2), lambda i: (0, 0)),
                pl.BlockSpec((H2, OUT), lambda i: (0, 0)),
                pl.BlockSpec((1, OUT), lambda i: (0, 0)),
            ],
            out_specs=pl.BlockSpec((tile, OUT), lambda i: (i, 0)),
            out_shape=jax.ShapeDtypeStruct((n_pad, OUT), jnp.float32),
            compiler_params=pltpu.CompilerParams(
                dimension_semantics=("parallel",)),
        )(x_in, fused["W1"], fused["b1"], fused["W2"], fused["b2"],
          fused["Wo"], fused["bo"])

        mu = slab[:N, :A]
        v = slab[:N, A]

    # log_std is a learned constant: broadcast outside the kernel.
    log_std = jnp.broadcast_to(fused["log_std"], (N, A))

    mu = mu.reshape(lead_shape + (A,))
    log_std = log_std.reshape(lead_shape + (A,))
    v = v.reshape(lead_shape)
    return mu, log_std, v


# -----------------------------------------------------------------------------
# Deterministic synthetic parameters (weights stored [in, out]).
# -----------------------------------------------------------------------------
def make_params(key, input_size, hidden_sizes, action_size, init_log_std=0.0):
    h1, h2 = hidden_sizes
    keys = jax.random.split(key, 6)

    def lin(k, fan_in, fan_out):
        kw, kb = jax.random.split(k)
        bound = 1.0 / jnp.sqrt(fan_in)
        w = jax.random.uniform(kw, (fan_in, fan_out), jnp.float32, -bound, bound)
        b = jax.random.uniform(kb, (1, fan_out), jnp.float32, -bound, bound)
        return w, b

    mu_w1, mu_b1 = lin(keys[0], input_size, h1)
    mu_w2, mu_b2 = lin(keys[1], h1, h2)
    mu_wo, mu_bo = lin(keys[2], h2, action_size)
    v_w1, v_b1 = lin(keys[3], input_size, h1)
    v_w2, v_b2 = lin(keys[4], h1, h2)
    v_wo, v_bo = lin(keys[5], h2, 1)
    log_std = jnp.full((1, action_size), init_log_std, dtype=jnp.float32)

    return dict(
        mu_w1=mu_w1, mu_b1=mu_b1, mu_w2=mu_w2, mu_b2=mu_b2,
        mu_wo=mu_wo, mu_bo=mu_bo,
        v_w1=v_w1, v_b1=v_b1, v_w2=v_w2, v_b2=v_b2,
        v_wo=v_wo, v_bo=v_bo,
        log_std=log_std,
    )


if __name__ == "__main__":
    key = jax.random.PRNGKey(0)
    k_param, k_obs1, k_obs2 = jax.random.split(key, 3)

    obs_dim = 16
    action_size = 8
    hidden_sizes = [64, 64]

    params = make_params(k_param, obs_dim, hidden_sizes, action_size,
                         init_log_std=0.0)
    # f32 fused weights (portable across v5e/v6e/v7x); pass
    # matmul_dtype=jnp.bfloat16 for an extra MXU/EUP win on v6e/v7x.
    fused = fuse_params(params, matmul_dtype=jnp.float32)

    def reference(observation):
        T_, B_ = observation.shape[:2]
        x = observation.reshape(T_ * B_, obs_dim)
        h = jnp.tanh(x @ params["mu_w1"] + params["mu_b1"])
        h = jnp.tanh(h @ params["mu_w2"] + params["mu_b2"])
        mu_r = jnp.tanh(h @ params["mu_wo"] + params["mu_bo"]).reshape(T_, B_, -1)
        hv = jnp.tanh(x @ params["v_w1"] + params["v_b1"])
        hv = jnp.tanh(hv @ params["v_w2"] + params["v_b2"])
        v_r = (hv @ params["v_wo"] + params["v_bo"])[:, 0].reshape(T_, B_)
        return mu_r, v_r

    # --- small shape: force the Pallas path (single 8-row tile) -------------
    T, B = 2, 4
    obs_small = jax.random.normal(k_obs1, (T, B, obs_dim), dtype=jnp.float32)
    mu, log_std, v = mujoco_ff_forward(obs_small, fused, obs_ndim=1,
                                       tile_rows=256, min_rows_for_kernel=0)
    jax.block_until_ready((mu, log_std, v))
    assert mu.shape == (T, B, action_size)
    assert log_std.shape == (T, B, action_size)
    assert v.shape == (T, B)
    mu_ref, v_ref = reference(obs_small)
    assert jnp.allclose(mu, mu_ref, atol=1e-4)
    assert jnp.allclose(v, v_ref, atol=1e-4)
    assert jnp.allclose(log_std, jnp.zeros((T, B, action_size)))

    # --- larger shape: exercises multi-step row grid + padding (N=1000) -----
    T2, B2 = 5, 200          # N = 1000 -> padded to 1024, 4 tiles of 256 rows
    obs_large = jax.random.normal(k_obs2, (T2, B2, obs_dim), dtype=jnp.float32)
    mu2, log_std2, v2 = mujoco_ff_forward(obs_large, fused, obs_ndim=1,
                                          tile_rows=256, min_rows_for_kernel=0)
    jax.block_until_ready((mu2, log_std2, v2))
    assert mu2.shape == (T2, B2, action_size)
    assert log_std2.shape == (T2, B2, action_size)
    assert v2.shape == (T2, B2)
    mu2_ref, v2_ref = reference(obs_large)
    assert jnp.allclose(mu2, mu2_ref, atol=1e-4)
    assert jnp.allclose(v2, v2_ref, atol=1e-4)

    print("KERNEL_OK")
</pallas_src>

<mosaic_0001>
module attributes {stable_mosaic.version = 11 : i64} {
  func.func @_mujoco_ff_fused_kernel(%arg0: i32, %arg1: memref<8x16xf32, #tpu.memory_space<vmem>>, %arg2: memref<16x128xf32, #tpu.memory_space<vmem>>, %arg3: memref<1x128xf32, #tpu.memory_space<vmem>>, %arg4: memref<128x128xf32, #tpu.memory_space<vmem>>, %arg5: memref<1x128xf32, #tpu.memory_space<vmem>>, %arg6: memref<128x128xf32, #tpu.memory_space<vmem>>, %arg7: memref<1x128xf32, #tpu.memory_space<vmem>>, %arg8: memref<8x128xf32, #tpu.memory_space<vmem>>) attributes {dimension_semantics = [#tpu.dimension_semantics<parallel>], iteration_bounds = array<i64: 1>, scalar_prefetch = 0 : i64, scratch_operands = 0 : i64, tpu.core_type = #tpu.core_type<tc>, window_params = [{transform_indices = @transform_0, window_bounds = array<i64: 8, 16>}, {pipeline_mode = #tpu.pipeline_mode<synchronous>, transform_indices = @transform_1, window_bounds = array<i64: 16, 128>}, {pipeline_mode = #tpu.pipeline_mode<synchronous>, transform_indices = @transform_2, window_bounds = array<i64: 1, 128>}, {pipeline_mode = #tpu.pipeline_mode<synchronous>, transform_indices = @transform_3, window_bounds = array<i64: 128, 128>}, {pipeline_mode = #tpu.pipeline_mode<synchronous>, transform_indices = @transform_4, window_bounds = array<i64: 1, 128>}, {pipeline_mode = #tpu.pipeline_mode<synchronous>, transform_indices = @transform_5, window_bounds = array<i64: 128, 128>}, {pipeline_mode = #tpu.pipeline_mode<synchronous>, transform_indices = @transform_6, window_bounds = array<i64: 1, 128>}, {transform_indices = @transform_7, window_bounds = array<i64: 8, 128>}]} {
    %c0 = arith.constant 0 : index
    %c0_0 = arith.constant 0 : index
    %0 = vector.load %arg1[%c0, %c0_0] : memref<8x16xf32, #tpu.memory_space<vmem>>, vector<8x16xf32>
    %c0_1 = arith.constant 0 : index
    %c0_2 = arith.constant 0 : index
    %1 = vector.load %arg2[%c0_1, %c0_2] : memref<16x128xf32, #tpu.memory_space<vmem>>, vector<16x128xf32>
    %cst = arith.constant dense<0.000000e+00> : vector<8x128xf32>
    %2 = tpu.matmul %0, %1, %cst {dimension_numbers = #tpu.dot_dimension_numbers<[1], [0], [0], [1], [0, 0, 1, 1], [], []>} : vector<8x16xf32>, vector<16x128xf32>, vector<8x128xf32> -> vector<8x128xf32>
    %c0_3 = arith.constant 0 : index
    %c0_4 = arith.constant 0 : index
    %3 = vector.load %arg3[%c0_3, %c0_4] : memref<1x128xf32, #tpu.memory_space<vmem>>, vector<1x128xf32>
    %4 = vector.broadcast %3 : vector<1x128xf32> to vector<8x128xf32>
    %5 = arith.addf %2, %4 : vector<8x128xf32>
    %6 = math.tanh %5 : vector<8x128xf32>
    %c0_5 = arith.constant 0 : index
    %c0_6 = arith.constant 0 : index
    %7 = vector.load %arg4[%c0_5, %c0_6] : memref<128x128xf32, #tpu.memory_space<vmem>>, vector<128x128xf32>
    %cst_7 = arith.constant dense<0.000000e+00> : vector<8x128xf32>
    %8 = tpu.matmul %6, %7, %cst_7 {dimension_numbers = #tpu.dot_dimension_numbers<[1], [0], [0], [1], [0, 0, 1, 1], [], []>} : vector<8x128xf32>, vector<128x128xf32>, vector<8x128xf32> -> vector<8x128xf32>
    %c0_8 = arith.constant 0 : index
    %c0_9 = arith.constant 0 : index
    %9 = vector.load %arg5[%c0_8, %c0_9] : memref<1x128xf32, #tpu.memory_space<vmem>>, vector<1x128xf32>
    %10 = vector.broadcast %9 : vector<1x128xf32> to vector<8x128xf32>
    %11 = arith.addf %8, %10 : vector<8x128xf32>
    %12 = math.tanh %11 : vector<8x128xf32>
    %c0_10 = arith.constant 0 : index
    %c0_11 = arith.constant 0 : index
    %13 = vector.load %arg6[%c0_10, %c0_11] : memref<128x128xf32, #tpu.memory_space<vmem>>, vector<128x128xf32>
    %cst_12 = arith.constant dense<0.000000e+00> : vector<8x128xf32>
    %14 = tpu.matmul %12, %13, %cst_12 {dimension_numbers = #tpu.dot_dimension_numbers<[1], [0], [0], [1], [0, 0, 1, 1], [], []>} : vector<8x128xf32>, vector<128x128xf32>, vector<8x128xf32> -> vector<8x128xf32>
    %c0_13 = arith.constant 0 : index
    %c0_14 = arith.constant 0 : index
    %15 = vector.load %arg7[%c0_13, %c0_14] : memref<1x128xf32, #tpu.memory_space<vmem>>, vector<1x128xf32>
    %16 = vector.broadcast %15 : vector<1x128xf32> to vector<8x128xf32>
    %17 = arith.addf %14, %16 : vector<8x128xf32>
    %18 = tpu.iota {dimensions = array<i32: 1>} : vector<8x128xi32>
    %c8_i32 = arith.constant 8 : i32
    %19 = vector.broadcast %c8_i32 : i32 to vector<8x128xi32>
    %20 = arith.cmpi slt, %18, %19 : vector<8x128xi32>
    %21 = math.tanh %17 : vector<8x128xf32>
    %22 = arith.select %20, %21, %17 : vector<8x128xi1>, vector<8x128xf32>
    %c0_15 = arith.constant 0 : index
    %c0_16 = arith.constant 0 : index
    %23 = vector.load %arg8[%c0_15, %c0_16] : memref<8x128xf32, #tpu.memory_space<vmem>>, vector<8x128xf32>
    tpu.vector_store %arg8[%c0_15, %c0_16], %22 {strides = array<i32>} : memref<8x128xf32, #tpu.memory_space<vmem>>, vector<8x128xf32>,
    return
  }
  func.func @transform_0(%arg0: i32) -> (i32, i32) {
    %c0_i32 = arith.constant 0 : i32
    %c0_i32_0 = arith.constant 0 : i32
    return %arg0, %c0_i32 : i32, i32
  }
  func.func @transform_1(%arg0: i32) -> (i32, i32) {
    %c0_i32 = arith.constant 0 : i32
    %c0_i32_0 = arith.constant 0 : i32
    %c0_i32_1 = arith.constant 0 : i32
    return %c0_i32, %c0_i32_0 : i32, i32
  }
  func.func @transform_2(%arg0: i32) -> (i32, i32) {
    %c0_i32 = arith.constant 0 : i32
    %c0_i32_0 = arith.constant 0 : i32
    %c0_i32_1 = arith.constant 0 : i32
    return %c0_i32, %c0_i32_0 : i32, i32
  }
  func.func @transform_3(%arg0: i32) -> (i32, i32) {
    %c0_i32 = arith.constant 0 : i32
    %c0_i32_0 = arith.constant 0 : i32
    %c0_i32_1 = arith.constant 0 : i32
    return %c0_i32, %c0_i32_0 : i32, i32
  }
  func.func @transform_4(%arg0: i32) -> (i32, i32) {
    %c0_i32 = arith.constant 0 : i32
    %c0_i32_0 = arith.constant 0 : i32
    %c0_i32_1 = arith.constant 0 : i32
    return %c0_i32, %c0_i32_0 : i32, i32
  }
  func.func @transform_5(%arg0: i32) -> (i32, i32) {
    %c0_i32 = arith.constant 0 : i32
    %c0_i32_0 = arith.constant 0 : i32
    %c0_i32_1 = arith.constant 0 : i32
    return %c0_i32, %c0_i32_0 : i32, i32
  }
  func.func @transform_6(%arg0: i32) -> (i32, i32) {
    %c0_i32 = arith.constant 0 : i32
    %c0_i32_0 = arith.constant 0 : i32
    %c0_i32_1 = arith.constant 0 : i32
    return %c0_i32, %c0_i32_0 : i32, i32
  }
  func.func @transform_7(%arg0: i32) -> (i32, i32) {
    %c0_i32 = arith.constant 0 : i32
    %c0_i32_0 = arith.constant 0 : i32
    return %arg0, %c0_i32 : i32, i32
  }
}

</mosaic_0001>

<bundles_post_ra>
// kernel: tpu_custom_call.1
= control target key start
LH: loop header
LB: loop body
LE: loop exit
PB: predicated region body
PF: predicated region fallthrough
CT: control target
= control target key end

     0   :  { %12 = vsyncpa [#allocation3], 0  ;;  %s826_s0 = inlined_call_operand.hbm [shape: f32[8,16], index: 0, kind: input, shape index: {}]   ;;  %s827_s1 = inlined_call_operand.hbm [shape: f32[16,128], index: 1, kind: input, shape index: {}]   ;;  %s828_s2 = inlined_call_operand.vmem [shape: f32[1,128], index: 2, kind: input, shape index: {}]   ;;  %s829_s3 = inlined_call_operand.hbm [shape: f32[128,128], index: 3, kind: input, shape index: {}]   ;;  %s830_s4 = inlined_call_operand.vmem [shape: f32[1,128], index: 4, kind: input, shape index: {}]   ;;  %s831_s5 = inlined_call_operand.hbm [shape: f32[128,128], index: 5, kind: input, shape index: {}]   ;;  %s832_s6 = inlined_call_operand.vmem [shape: f32[1,128], index: 6, kind: input, shape index: {}]   ;;  %s833_s7 = inlined_call_operand.hbm [shape: f32[8,128], index: 7, kind: output, shape index: {}]  }
   0x1   :  { %13 = vsyncpa [#allocation6], 0 }
   0x2   :  { %14 = vsyncpa [#allocation9], 0 }
   0x3   :  { %15 = vsyncpa [#allocation4], 0  ;;  %s678_s24 = smov [#allocation5]   ;;  %s560_s28 = scalar_lea.hbm %s827_s1, 256 }
   0x4   :  { %s31_s25 = sshll.u32 %s678_s24, 4  ;;  %p561_p0 = scmp.ne.s32.totalorder %s827_s1, %s560_s28  ;;  %s32_s25 = int_to_ptr.vmem [resolvable:$true] %s31_s25 }
   0x5   :  { %p564_p1 = scmp.lt.u32.totalorder %s560_s28, %s827_s1 }
   0x7   :  { %p566_p2 = pnand %p564_p1, %p561_p0 }
   0x9   :  { %569 = shalt.err (!%p566_p2)
}
   0xa   :  { %s570_s10 = scalar_lea.vmem %s32_s25, 256  ;;  %p575_p4 = scmp.lt.s32.totalorder %s32_s25, %s32_s25 }
   0xb   :  { %p571_p3 = scmp.ne.s32.totalorder %s32_s25, %s570_s10  ;;  %p576_p5 = scmp.lt.s32.totalorder %s570_s10, %s570_s10 }
   0xd   :  { %p577_p6 = por %p576_p5, %p575_p4 }
   0xf   :  { %p578_p7 = pnand %p577_p6, %p571_p3 }
  0x11   :  { %581 = shalt.err (!%p578_p7)
}
  0x12   :  { %s679_s11 = smov 128   ;;  %s680_s12 = smov 8  }
  0x13   :  { %37 = dma.hbm_to_vmem [thread:$0]  %s827_s1, 256, %s32_s25, [#allocation6], %s679_s11, %s679_s11, %s680_s12  }
  0x14   :  { %s681_s15 = smov [#allocation2]   ;;  %s682_s17 = smov [#allocation7]  }
  0x15   :  { %s22_s16 = sshll.u32 %s681_s15, 4  ;;  %s45_s18 = sshll.u32 %s682_s17, 4  ;;  %s23_s16 = int_to_ptr.vmem [resolvable:$true] %s22_s16  ;;  %s46_s18 = int_to_ptr.vmem [resolvable:$true] %s45_s18 }
  0x16   :  { %s582_s21 = scalar_lea.hbm %s826_s0, 128 }
  0x17   :  { %p583_p8 = scmp.ne.s32.totalorder %s826_s0, %s582_s21  ;;  %p586_p9 = scmp.lt.u32.totalorder %s582_s21, %s826_s0 }
  0x19   :  { %p588_p10 = pnand %p586_p9, %p583_p8 }
  0x1b   :  { %591 = shalt.err (!%p588_p10)
}
  0x1c   :  { %s592_s1 = scalar_lea.vmem %s23_s16, 128  ;;  %p597_p12 = scmp.lt.s32.totalorder %s23_s16, %s23_s16 }
  0x1d   :  { %p593_p11 = scmp.ne.s32.totalorder %s23_s16, %s592_s1  ;;  %p598_p13 = scmp.lt.s32.totalorder %s592_s1, %s592_s1 }
  0x1f   :  { %p599_p0 = por %p598_p13, %p597_p12 }
  0x21   :  { %p600_p1 = pnand %p599_p0, %p593_p11 }
  0x23   :  { %603 = shalt.err (!%p600_p1)
}
  0x24   :  { %25 = dma.hbm_to_vmem [thread:$0]  %s826_s0, 128, %s23_s16, [#allocation3]  }
  0x25   :  { %s604_s30 = scalar_lea.hbm %s829_s3, 2048 }
  0x26   :  { %p605_p2 = scmp.ne.s32.totalorder %s829_s3, %s604_s30  ;;  %p608_p3 = scmp.lt.u32.totalorder %s604_s30, %s829_s3 }
  0x28   :  { %p610_p4 = pnand %p608_p3, %p605_p2 }
  0x2a   :  { %613 = shalt.err (!%p610_p4)
}
  0x2b   :  { %s614_s14 = scalar_lea.vmem %s46_s18, 2048  ;;  %p619_p6 = scmp.lt.s32.totalorder %s46_s18, %s46_s18 }
  0x2c   :  { %p615_p5 = scmp.ne.s32.totalorder %s46_s18, %s614_s14  ;;  %p620_p7 = scmp.lt.s32.totalorder %s614_s14, %s614_s14 }
  0x2e   :  { %p621_p8 = por %p620_p7, %p619_p6 }
  0x30   :  { %p622_p9 = pnand %p621_p8, %p615_p5 }
  0x32   :  { %625 = shalt.err (!%p622_p9)
}
  0x33   :  { %51 = dma.hbm_to_vmem [thread:$0]  %s829_s3, 2048, %s46_s18, [#allocation6], %s679_s11, %s679_s11, %s680_s12  }
  0x34   :  { %s683_s16 = smov [#allocation8]   ;;  %s626_s21 = scalar_lea.hbm %s831_s5, 2048 }
  0x35   :  { %s59_s17 = sshll.u32 %s683_s16, 4  ;;  %p627_p10 = scmp.ne.s32.totalorder %s831_s5, %s626_s21  ;;  %s60_s17 = int_to_ptr.vmem [resolvable:$true] %s59_s17 }
  0x36   :  { %p630_p11 = scmp.lt.u32.totalorder %s626_s21, %s831_s5 }
  0x38   :  { %p632_p12 = pnand %p630_p11, %p627_p10 }
  0x3a   :  { %635 = shalt.err (!%p632_p12)
}
  0x3b   :  { %s636_s1 = scalar_lea.vmem %s60_s17, 2048  ;;  %p641_p0 = scmp.lt.s32.totalorder %s60_s17, %s60_s17 }
  0x3c   :  { %p637_p13 = scmp.ne.s32.totalorder %s60_s17, %s636_s1  ;;  %p642_p1 = scmp.lt.s32.totalorder %s636_s1, %s636_s1 }
  0x3e   :  { %p643_p2 = por %p642_p1, %p641_p0 }
  0x40   :  { %p644_p3 = pnand %p643_p2, %p637_p13 }
  0x42   :  { %647 = shalt.err (!%p644_p3)
}
  0x43   :  { %65 = dma.hbm_to_vmem [thread:$0]  %s831_s5, 2048, %s60_s17, [#allocation9], %s679_s11, %s679_s11, %s680_s12  }
  0x44   :  { %670 = dma.done.wait [#allocation3], 128  }
  0x45   :  { %671 = vsyncadd [#allocation3], 4294967168 }
  0x46   :  { %672 = dma.done.wait [#allocation6], 2304  }
  0x47   :  { %673 = vsyncadd [#allocation6], 4294964992 }
  0x48   :  { %674 = dma.done.wait [#allocation9], 2048  }
  0x49   :  { %675 = vsyncadd [#allocation9], 4294965248  ;;  %v684_v0 = vmov 0.0|0.0   ;;  %vm685_vm0 = vmmov 0   ;;  %v686_v1 = vmov 0.0   ;;  %v81_v2 = vld [vmem:[#allocation5] sm:$0xff] }
  0x4a   :  { %493 = vmatprep.subr.bf16.mxu0 %v684_v0  ;;  %420 = vmatprep.mubr.msk.f32.mxu0 %vm685_vm0, %v686_v1  ;;  %v82_v3 = vld [vmem:[#allocation5 + $0x8] sm:$0xff]  ;;  %v165_v5 = vld [vmem:[#allocation7] sm:$0xff]  ;;  %v166_v6 = vld [vmem:[#allocation7 + $0x8] sm:$0xff]  ;;  %vm90_vm1 = vcmask 130048   ;;  %s687_s28 = smov [#allocation10]  }
  0x4b   :  { %496 = vmatprep.subr.bf16.mxu1 %v684_v0  ;;  %455 = vmatprep.mubr.msk.f32.mxu1 %vm685_vm0, %v686_v1  ;;  %v494_v4 = vpack.c.bf16 %v82_v3, %v81_v2  ;;  %v167_v7 = vld [vmem:[#allocation7 + $0x10] sm:$0xff]  ;;  %v497_v8 = vpack.c.bf16 %v166_v6, %v165_v5  ;;  %v168_v9 = vld [vmem:[#allocation7 + $0x18] sm:$0xff]  ;;  %v80_v10 = vld [vmem:[#allocation2] sm:$0xff]  ;;  %s364_s29 = sshll.u32 %s687_s28, 4  ;;  %s365_s29 = int_to_ptr.vmem [resolvable:$true] %s364_s29 }
  0x4c   :  { %v500_v11 = vpack.c.bf16 %v168_v9, %v167_v7  ;;  %v169_v12 = vld [vmem:[#allocation7 + $0x20] sm:$0xff]  ;;  %v170_v13 = vld [vmem:[#allocation7 + $0x28] sm:$0xff]  ;;  %v171_v15 = vld [vmem:[#allocation7 + $0x30] sm:$0xff]  ;;  %p653_p5 = scmp.lt.s32.totalorder %s365_s29, %s365_s29 }
  0x4d   :  { %495 = vmatpush3.bf16.msra.mxu0 %v494_v4  ;;  %498 = vmatpush3.bf16.msra.mxu1 %v497_v8  ;;  %v503_v14 = vpack.c.bf16 %v170_v13, %v169_v12  ;;  %v172_v16 = vld [vmem:[#allocation7 + $0x38] sm:$0xff]  ;;  %v173_v18 = vld [vmem:[#allocation7 + $0x40] sm:$0xff]  ;;  %v174_v19 = vld [vmem:[#allocation7 + $0x48] sm:$0xff] }
  0x4e   :  { %520 = vmatprep.subr.bf16.mxu0 %v684_v0  ;;  %499 = vmatprep.subr.bf16.mxu1 %v684_v0  ;;  %v506_v17 = vpack.c.bf16 %v172_v16, %v171_v15  ;;  %v509_v20 = vpack.c.bf16 %v174_v19, %v173_v18  ;;  %v175_v21 = vld [vmem:[#allocation7 + $0x50] sm:$0xff]  ;;  %v176_v22 = vld [vmem:[#allocation7 + $0x58] sm:$0xff]  ;;  %v177_v24 = vld [vmem:[#allocation7 + $0x60] sm:$0xff] }
  0x4f   :  { %v512_v23 = vpack.c.bf16 %v176_v22, %v175_v21  ;;  %v178_v25 = vld [vmem:[#allocation7 + $0x68] sm:$0xff]  ;;  %v179_v27 = vld [vmem:[#allocation7 + $0x70] sm:$0xff]  ;;  %v180_v28 = vld [vmem:[#allocation7 + $0x78] sm:$0xff] }
  0x50   :  { %421 = vmatmul.mubr.msk.f32.vlgmr.msra.gmra.mrb[0].mxu0 %vm90_vm1, %v80_v10  ;;  %v515_v26 = vpack.c.bf16 %v178_v25, %v177_v24  ;;  %v518_v29 = vpack.c.bf16 %v180_v28, %v179_v27  ;;  %v259_v30 = vld [vmem:[#allocation8] sm:$0xff]  ;;  %v260_v31 = vld [vmem:[#allocation8 + $0x8] sm:$0xff]  ;;  %v261_v32 = vld [vmem:[#allocation8 + $0x10] sm:$0xff] }
  0x51   :  { %490 = vmatprep.mubr.msk.f32.mxu0 %vm685_vm0, %v686_v1  ;;  %501 = vmatpush3.bf16.msra.mxu1 %v500_v11  ;;  %v521_v33 = vpack.c.bf16 %v260_v31, %v259_v30  ;;  %v262_v34 = vld [vmem:[#allocation8 + $0x18] sm:$0xff]  ;;  %v263_v36 = vld [vmem:[#allocation8 + $0x20] sm:$0xff]  ;;  %v264_v37 = vld [vmem:[#allocation8 + $0x28] sm:$0xff] }
  0x52   :  { %502 = vmatprep.subr.bf16.mxu1 %v684_v0  ;;  %v524_v35 = vpack.c.bf16 %v262_v34, %v261_v32  ;;  %v527_v38 = vpack.c.bf16 %v264_v37, %v263_v36  ;;  %v265_v39 = vld [vmem:[#allocation8 + $0x30] sm:$0xff]  ;;  %v266_v40 = vld [vmem:[#allocation8 + $0x38] sm:$0xff]  ;;  %v267_v42 = vld [vmem:[#allocation8 + $0x40] sm:$0xff] }
  0x53   :  { %522 = vmatpush3.bf16.msra.mxu0 %v521_v33  ;;  %v530_v41 = vpack.c.bf16 %v266_v40, %v265_v39  ;;  %v268_v43 = vld [vmem:[#allocation8 + $0x48] sm:$0xff]  ;;  %v269_v50 = vld [vmem:[#allocation8 + $0x50] sm:$0xff]  ;;  %v270_v51 = vld [vmem:[#allocation8 + $0x58] sm:$0xff] }
  0x54   :  { %523 = vmatprep.subr.bf16.mxu0 %v684_v0  ;;  %v533_v44 = vpack.c.bf16 %v268_v43, %v267_v42  ;;  %v375_v45 = vld [vmem:[%s828_s2] ss:$0 sm:$0xff]  ;;  %v536_v52 = vpack.c.bf16 %v270_v51, %v269_v50  ;;  %v271_v53 = vld [vmem:[#allocation8 + $0x60] sm:$0xff]  ;;  %v273_v56 = vld [vmem:[#allocation8 + $0x70] sm:$0xff] }
  0x55   :  { %504 = vmatpush3.bf16.msra.mxu1 %v503_v14  ;;  %v272_v54 = vld [vmem:[#allocation8 + $0x68] sm:$0xff]  ;;  %v274_v57 = vld [vmem:[#allocation8 + $0x78] sm:$0xff] }
  0x56   :  { %505 = vmatprep.subr.bf16.mxu1 %v684_v0  ;;  %v539_v55 = vpack.c.bf16 %v272_v54, %v271_v53  ;;  %v542_v58 = vpack.c.bf16 %v274_v57, %v273_v56  ;;  %v377_v59 = vld [vmem:[%s830_s4] ss:$0 sm:$0xff]  ;;  %s648_s4 = scalar_lea.vmem %s365_s29, 128 }
  0x57   :  { %525 = vmatpush3.bf16.msra.mxu0 %v524_v35  ;;  %v378_v1 = vld [vmem:[%s832_s6] ss:$0 sm:$0xff]  ;;  %p649_p4 = scmp.ne.s32.totalorder %s365_s29, %s648_s4  ;;  %p654_p6 = scmp.lt.s32.totalorder %s648_s4, %s648_s4 }
  0x58   :  { %526 = vmatprep.subr.bf16.mxu0 %v684_v0 }
  0x59   :  { %507 = vmatpush3.bf16.msra.mxu1 %v506_v17  ;;  %p655_p7 = por %p654_p6, %p653_p5 }
  0x5a   :  { %508 = vmatprep.subr.bf16.mxu1 %v684_v0 }
  0x5b   :  { %528 = vmatpush3.bf16.msra.mxu0 %v527_v38  ;;  %p656_p8 = pnand %p655_p7, %p649_p4 }
  0x5c   :  { %529 = vmatprep.subr.bf16.mxu0 %v684_v0 }
  0x5d   :  { %510 = vmatpush3.bf16.msra.mxu1 %v509_v20 }
  0x5e   :  { %511 = vmatprep.subr.bf16.mxu1 %v684_v0 }
  0x5f   :  { %531 = vmatpush3.bf16.msra.mxu0 %v530_v41 }
  0x60   :  { %532 = vmatprep.subr.bf16.mxu0 %v684_v0 }
  0x61   :  { %513 = vmatpush3.bf16.msra.mxu1 %v512_v23 }
  0x62   :  { %514 = vmatprep.subr.bf16.mxu1 %v684_v0 }
  0x63   :  { %534 = vmatpush3.bf16.msra.mxu0 %v533_v44 }
  0x64   :  { %535 = vmatprep.subr.bf16.mxu0 %v684_v0 }
  0x65   :  { %516 = vmatpush3.bf16.msra.mxu1 %v515_v26 }
  0x66   :  { %517 = vmatprep.subr.bf16.mxu1 %v684_v0 }
  0x67   :  { %537 = vmatpush3.bf16.msra.mxu0 %v536_v52 }
  0x68   :  { %538 = vmatprep.subr.bf16.mxu0 %v684_v0 }
  0x69   :  { %519 = vmatpush3.bf16.msra.mxu1 %v518_v29 }
  0x6b   :  { %540 = vmatpush3.bf16.msra.mxu0 %v539_v55 }
  0x6c   :  { %541 = vmatprep.subr.bf16.mxu0 %v684_v0  ;;  %v352_v0 = vlaneseq }
  0x6e   :  { %v353_v5 = vand.u32 127, %v352_v0 }
  0x6f   :  { %543 = vmatpush3.bf16.msra.mxu0 %v542_v58 }
  0x70   :  { %vm354_vm2 = vcmp.lt.s32.totalorder %v353_v5, 8 }
 0x123   :  { %v160_v46 = vpop.f32.mrb[0].mxu0 }
 0x124   :  { %v161_v47 = vadd.f32 %v375_v45, %v160_v46  ;;  %v422_v48 = vpop.f32.mrb[1].mxu0 }
 0x126   :  { %554 = vtanh.f32 %v161_v47 }
 0x130   :  { %v555_v49 = vpop.eup %554 }
 0x131   :  { %456 = vmatmul.mubr.f32.vlgmr.msra.gmra.mrb[0].mxu1 %v555_v49 }
 0x204   :  { %v254_v60 = vpop.f32.mrb[0].mxu1 }
 0x205   :  { %v255_v61 = vadd.f32 %v377_v59, %v254_v60  ;;  %v457_v62 = vpop.f32.mrb[1].mxu1 }
 0x207   :  { %556 = vtanh.f32 %v255_v61 }
 0x211   :  { %v557_v63 = vpop.eup %556 }
 0x212   :  { %491 = vmatmul.mubr.f32.vlgmr.msra.gmra.mrb[2].mxu0 %v557_v63 }
 0x2e5   :  { %v348_v2 = vpop.f32.mrb[2].mxu0 }
 0x2e6   :  { %v349_v3 = vadd.f32 %v378_v1, %v348_v2  ;;  %v492_v4 = vpop.f32.mrb[3].mxu0 }
 0x2e8   :  { %558 = vtanh.f32 %v349_v3 }
 0x2f2   :  { %v559_v6 = vpop.eup %558 }
 0x2f3   :  { %v356_v7 = vsel %vm354_vm2, %v559_v6, %v349_v3 }
 0x2f4   :  { %357 = vst [vmem:[#allocation10] sm:$0xff] %v356_v7 }
 0x2f5   :  { %659 = shalt.err (!%p656_p8)
}
 0x2f6   :  { %s660_s8 = scalar_lea.hbm %s833_s7, 128 }
 0x2f7   :  { %p661_p9 = scmp.ne.s32.totalorder %s833_s7, %s660_s8  ;;  %p664_p10 = scmp.lt.u32.totalorder %s660_s8, %s833_s7 }
 0x2f9   :  { %p666_p11 = pnand %p664_p10, %p661_p9 }
 0x2fb   :  { %669 = shalt.err (!%p666_p11)
}
 0x2fc   :  { %367 = dma.vmem_to_hbm [thread:$0]  %s365_s29, 128, %s833_s7, [#allocation4]  }
 0x2fd   :  { %676 = dma.done.wait [#allocation4], 128  }
 0x2fe   :  { %677 = vsyncadd [#allocation4], 4294967168 }
 0x2ff   :  { %371 = vsyncpa [#allocation3], 1 }
 0x300   :  { %372 = vsyncpa [#allocation6], 1 }
 0x301   :  { %373 = vsyncpa [#allocation9], 1 }
 0x302   :  { %374 = vsyncpa [#allocation4], 1 }

</bundles_post_ra>
